<compile_context>
chip_gen: v7x
topology: tpu7x:2x2x1
jax: 0.10.0
libtpu: 0.0.40
codegen_flags: <defaults>
</compile_context>

<pallas_src>
import jax
import jax.numpy as jnp
from jax.experimental import pallas as pl
from jax.experimental.pallas import tpu as pltpu


def _acon_kernel(x_ref, par_ref, o_ref):
    x = x_ref[...].astype(jnp.float32)       # (bm, bn)
    par = par_ref[...]                       # (bm, 3) f32: [p1-p2, p2, beta]
    dp = par[:, 0:1]                         # p1 - p2  -> broadcasts over lanes
    p2 = par[:, 1:2]
    beta = par[:, 2:3]
    d = dp * x                               # (p1 - p2) * x
    px2 = p2 * x                             # p2 * x, computed once
    z = beta * d
    sig = 0.5 * jnp.tanh(0.5 * z) + 0.5      # == sigmoid(z), 1 EUP push
    o_ref[...] = (d * sig + px2).astype(o_ref.dtype)


def _round_up(a, m):
    return ((a + m - 1) // m) * m


def acon_forward(x, p1, p2, beta, *, target_block_bytes=2 << 20,
                 min_block_bytes=512 << 10, max_bn=2048):
    """x: (N, C, H, W); p1/p2/beta: (1, C, 1, 1). Returns (N, C, H, W)."""
    N, C, H, W = x.shape
    HW = H * W
    rows = N * C
    itemsize = jnp.dtype(x.dtype).itemsize
    sub = 8 * max(1, 4 // itemsize)          # sublane multiple: 8 f32, 16 bf16

    # Lane (column) block: multiple of 128, capped so huge spatial sizes don't
    # force over-sized tiles (keeps VMEM bounded on every generation).
    bn = min(_round_up(HW, 128), max_bn)
    col_blocks = pl.cdiv(HW, bn)

    # Row block: byte-budgeted, multiple of the sublane packing.
    rows_sub = _round_up(rows, sub)
    bm = max(sub, (target_block_bytes // (bn * itemsize)) // sub * sub)
    bm = min(bm, rows_sub)

    # Deepen the parallel row axis for v7x's 2 TensorCores: aim for >= ~8
    # total grid steps and an even row-block count, but keep tiles above
    # min_block_bytes so the ~0.35 us/step overhead stays amortized.
    if pl.cdiv(rows, bm) * col_blocks < 8:
        need_rb = -(-8 // col_blocks)        # ceil(8 / col_blocks)
        if need_rb > 1 and need_rb % 2:
            need_rb += 1                     # even split across the 2 TCs
        bm_deep = max(sub, (rows_sub // need_rb) // sub * sub)
        bm_floor = max(sub, (min_block_bytes // (bn * itemsize)) // sub * sub)
        bm = min(bm, max(bm_deep, bm_floor))

    grid = (pl.cdiv(rows, bm), col_blocks)

    # Free view: (N, C, H, W) -> (N*C, H*W); no pad, no extra HBM pass.
    x2 = x.reshape(rows, HW)

    # Tiny (rows, 3) parameter table: [p1 - p2, p2, beta] per (n, c) row.
    par = jnp.stack(
        [(p1 - p2).reshape(C), p2.reshape(C), beta.reshape(C)],
        axis=-1).astype(jnp.float32)                               # (C, 3)
    par = jnp.broadcast_to(par[None], (N, C, 3)).reshape(rows, 3)  # (rows, 3)

    out2 = pl.pallas_call(
        _acon_kernel,
        out_shape=jax.ShapeDtypeStruct((rows, HW), x.dtype),
        grid=grid,
        in_specs=[pl.BlockSpec((bm, bn), lambda i, j: (i, j)),
                  pl.BlockSpec((bm, 3), lambda i, j: (i, 0))],
        out_specs=pl.BlockSpec((bm, bn), lambda i, j: (i, j)),
        compiler_params=pltpu.CompilerParams(
            dimension_semantics=("parallel", "parallel")),
    )(x2, par)

    return out2.reshape(N, C, H, W)


def acon_reference(x, p1, p2, beta):
    d = p1 * x - p2 * x
    return d * jax.nn.sigmoid(beta * d) + p2 * x


if __name__ == "__main__":
    key = jax.random.PRNGKey(0)
    kx, kp1, kp2 = jax.random.split(key, 3)

    N, C, H, W = 2, 4, 16, 16
    x = jax.random.normal(kx, (N, C, H, W), dtype=jnp.float32)

    # Parameter init mirroring the module's __init__:
    # p1, p2 ~ randn(1, C, 1, 1); beta = ones(1, C, 1, 1).
    p1 = jax.random.normal(kp1, (1, C, 1, 1), dtype=jnp.float32)
    p2 = jax.random.normal(kp2, (1, C, 1, 1), dtype=jnp.float32)
    beta = jnp.ones((1, C, 1, 1), dtype=jnp.float32)

    out = acon_forward(x, p1, p2, beta)
    out = jax.block_until_ready(out)

    ref = acon_reference(x, p1, p2, beta)
    assert out.shape == (N, C, H, W)
    assert jnp.allclose(out, ref, atol=1e-5, rtol=1e-5)

    print("KERNEL_OK")
</pallas_src>

<mosaic_0001>
module attributes {stable_mosaic.version = 11 : i64} {
  func.func @_acon_kernel(%arg0: i32, %arg1: i32, %arg2: memref<8x256xf32, #tpu.memory_space<vmem>>, %arg3: memref<8x3xf32, #tpu.memory_space<vmem>>, %arg4: memref<8x256xf32, #tpu.memory_space<vmem>>) attributes {dimension_semantics = [#tpu.dimension_semantics<parallel>, #tpu.dimension_semantics<parallel>], iteration_bounds = array<i64: 1, 1>, scalar_prefetch = 0 : i64, scratch_operands = 0 : i64, tpu.core_type = #tpu.core_type<tc>, window_params = [{transform_indices = @transform_0, window_bounds = array<i64: 8, 256>}, {transform_indices = @transform_1, window_bounds = array<i64: 8, 3>}, {transform_indices = @transform_2, window_bounds = array<i64: 8, 256>}]} {
    %c0 = arith.constant 0 : index
    %c0_0 = arith.constant 0 : index
    %0 = vector.load %arg2[%c0, %c0_0] : memref<8x256xf32, #tpu.memory_space<vmem>>, vector<8x256xf32>
    %c0_1 = arith.constant 0 : index
    %c0_2 = arith.constant 0 : index
    %1 = vector.load %arg3[%c0_1, %c0_2] : memref<8x3xf32, #tpu.memory_space<vmem>>, vector<8x3xf32>
    %2 = vector.extract_strided_slice %1 {offsets = [0, 0], sizes = [8, 1], strides = [1, 1]} : vector<8x3xf32> to vector<8x1xf32>
    %3 = vector.extract_strided_slice %1 {offsets = [0, 1], sizes = [8, 1], strides = [1, 1]} : vector<8x3xf32> to vector<8x1xf32>
    %4 = vector.extract_strided_slice %1 {offsets = [0, 2], sizes = [8, 1], strides = [1, 1]} : vector<8x3xf32> to vector<8x1xf32>
    %5 = vector.broadcast %2 : vector<8x1xf32> to vector<8x256xf32>
    %6 = arith.mulf %5, %0 : vector<8x256xf32>
    %7 = vector.broadcast %3 : vector<8x1xf32> to vector<8x256xf32>
    %8 = arith.mulf %7, %0 : vector<8x256xf32>
    %9 = vector.broadcast %4 : vector<8x1xf32> to vector<8x256xf32>
    %10 = arith.mulf %9, %6 : vector<8x256xf32>
    %cst = arith.constant 5.000000e-01 : f32
    %11 = vector.broadcast %cst : f32 to vector<8x256xf32>
    %12 = arith.mulf %11, %10 : vector<8x256xf32>
    %13 = math.tanh %12 : vector<8x256xf32>
    %cst_3 = arith.constant 5.000000e-01 : f32
    %14 = vector.broadcast %cst_3 : f32 to vector<8x256xf32>
    %15 = arith.mulf %14, %13 : vector<8x256xf32>
    %cst_4 = arith.constant 5.000000e-01 : f32
    %16 = vector.broadcast %cst_4 : f32 to vector<8x256xf32>
    %17 = arith.addf %15, %16 : vector<8x256xf32>
    %18 = arith.mulf %6, %17 : vector<8x256xf32>
    %19 = arith.addf %18, %8 : vector<8x256xf32>
    %c0_5 = arith.constant 0 : index
    %c0_6 = arith.constant 0 : index
    %20 = vector.load %arg4[%c0_5, %c0_6] : memref<8x256xf32, #tpu.memory_space<vmem>>, vector<8x256xf32>
    tpu.vector_store %arg4[%c0_5, %c0_6], %19 {strides = array<i32>} : memref<8x256xf32, #tpu.memory_space<vmem>>, vector<8x256xf32>,
    return
  }
  func.func @transform_0(%arg0: i32, %arg1: i32) -> (i32, i32) {
    %c0_i32 = arith.constant 0 : i32
    return %arg0, %arg1 : i32, i32
  }
  func.func @transform_1(%arg0: i32, %arg1: i32) -> (i32, i32) {
    %c0_i32 = arith.constant 0 : i32
    %c0_i32_0 = arith.constant 0 : i32
    return %arg0, %c0_i32 : i32, i32
  }
  func.func @transform_2(%arg0: i32, %arg1: i32) -> (i32, i32) {
    %c0_i32 = arith.constant 0 : i32
    return %arg0, %arg1 : i32, i32
  }
}

</mosaic_0001>

<bundles_post_ra>
// kernel: tpu_custom_call.1
= control target key start
LH: loop header
LB: loop body
LE: loop exit
PB: predicated region body
PF: predicated region fallthrough
CT: control target
= control target key end

     0   :  { %7 = vsyncpa [#allocation3], 0  ;;  %s182_s0 = inlined_call_operand.hbm [shape: f32[8,256], index: 0, kind: input, shape index: {}]   ;;  %s183_s1 = inlined_call_operand.vmem [shape: f32[8,3], index: 1, kind: input, shape index: {}]   ;;  %s184_s2 = inlined_call_operand.hbm [shape: f32[8,256], index: 2, kind: output, shape index: {}]  }
   0x1   :  { %8 = vsyncpa [#allocation4], 0  ;;  %s135_s9 = smov [#allocation2]   ;;  %s87_s13 = scalar_lea.hbm %s182_s0, 256 }
   0x2   :  { %s15_s10 = sshll.u32 %s135_s9, 4  ;;  %p88_p0 = scmp.ne.s32.totalorder %s182_s0, %s87_s13  ;;  %s16_s10 = int_to_ptr.vmem [resolvable:$true] %s15_s10 }
   0x3   :  { %p91_p1 = scmp.lt.u32.totalorder %s87_s13, %s182_s0 }
   0x5   :  { %p93_p2 = pnand %p91_p1, %p88_p0 }
   0x7   :  { %96 = shalt.err (!%p93_p2)
}
   0x8   :  { %s97_s18 = scalar_lea.vmem %s16_s10, 256  ;;  %p102_p4 = scmp.lt.s32.totalorder %s16_s10, %s16_s10 }
   0x9   :  { %p98_p3 = scmp.ne.s32.totalorder %s16_s10, %s97_s18  ;;  %p103_p5 = scmp.lt.s32.totalorder %s97_s18, %s97_s18 }
   0xb   :  { %p104_p6 = por %p103_p5, %p102_p4 }
   0xd   :  { %p105_p7 = pnand %p104_p6, %p98_p3 }
   0xf   :  { %108 = shalt.err (!%p105_p7)
}
  0x10   :  { %18 = dma.hbm_to_vmem [thread:$0]  %s182_s0, 256, %s16_s10, [#allocation3]  }
  0x11   :  { %131 = dma.done.wait [#allocation3], 256  }
  0x12   :  { %132 = vsyncadd [#allocation3], 4294967040  ;;  %v136_v0 = vmov 0   ;;  %v137_v1 = vmov 1   ;;  %v26_v2 = vld [vmem:[%s183_s1] sm:$0xff]  ;;  %v138_v3 = vmov 2  }
  0x13   :  { %80 = vset.pattern.permute.xlu0 %v136_v0  ;;  %82 = vset.pattern.permute.xlu1 %v137_v1  ;;  %v24_v5 = vld [vmem:[#allocation2] sm:$0xff]  ;;  %v25_v6 = vld [vmem:[#allocation2 + $0x8] sm:$0xff]  ;;  %s139_s0 = smov [#allocation5]  }
  0x14   :  { %29 = vperm.xlu0 %80, %v26_v2   ;;  %35 = vperm.xlu1 %82, %v26_v2   ;;  %s66_s1 = sshll.u32 %s139_s0, 4  ;;  %s67_s1 = int_to_ptr.vmem [resolvable:$true] %s66_s1 }
  0x15   :  { %s109_s23 = scalar_lea.vmem %s67_s1, 256  ;;  %p114_p9 = scmp.lt.s32.totalorder %s67_s1, %s67_s1 }
  0x16   :  { %p110_p8 = scmp.ne.s32.totalorder %s67_s1, %s109_s23  ;;  %p115_p10 = scmp.lt.s32.totalorder %s109_s23, %s109_s23 }
  0x18   :  { %81 = vset.pattern.permute.xlu0 %v138_v3  ;;  %p116_p11 = por %p115_p10, %p114_p9 }
  0x19   :  { %41 = vperm.xlu0 %81, %v26_v2  }
  0x1a   :  { %p117_p12 = pnand %p116_p11, %p110_p8 }
  0x93   :  { %v30_v4 = vpop.permute.xlu0 %29  ;;  %v36_v15 = vpop.permute.xlu1 %35 }
  0x94   :  { %v32_v7 = vmul.f32 %v30_v4, %v24_v5  ;;  %v33_v8 = vmul.f32 %v30_v4, %v25_v6  ;;  %v38_v20 = vmul.f32 %v36_v15, %v24_v5  ;;  %v39_v22 = vmul.f32 %v36_v15, %v25_v6 }
  0x98   :  { %v42_v9 = vpop.permute.xlu0 %41 }
  0x99   :  { %v44_v10 = vmul.f32 %v42_v9, %v32_v7  ;;  %v45_v11 = vmul.f32 %v42_v9, %v33_v8 }
  0x9b   :  { %v46_v12 = vmul.f32 0.5, %v44_v10  ;;  %v47_v13 = vmul.f32 0.5, %v45_v11 }
  0x9d   :  { %83 = vtanh.f32 %v46_v12 }
  0x9e   :  { %85 = vtanh.f32 %v47_v13 }
  0xa7   :  { %v84_v14 = vpop.eup %83 }
  0xa8   :  { %v86_v16 = vpop.eup %85  ;;  %v50_v17 = vmul.f32 0.5, %v84_v14 }
  0xa9   :  { %v51_v18 = vmul.f32 0.5, %v86_v16 }
  0xaa   :  { %v52_v19 = vadd.f32 0.5, %v50_v17 }
  0xab   :  { %v53_v21 = vadd.f32 0.5, %v51_v18 }
  0xac   :  { %v54_v23 = vmul.f32 %v52_v19, %v32_v7 }
  0xad   :  { %v55_v24 = vmul.f32 %v53_v21, %v33_v8 }
  0xae   :  { %v56_v25 = vadd.f32 %v54_v23, %v38_v20 }
  0xaf   :  { %v57_v26 = vadd.f32 %v55_v24, %v39_v22 }
  0xb0   :  { %58 = vst [vmem:[#allocation5] sm:$0xff] %v56_v25 }
  0xb1   :  { %59 = vst [vmem:[#allocation5 + $0x8] sm:$0xff] %v57_v26 }
  0xb2   :  { %120 = shalt.err (!%p117_p12)
}
  0xb3   :  { %s121_s26 = scalar_lea.hbm %s184_s2, 256 }
  0xb4   :  { %p122_p13 = scmp.ne.s32.totalorder %s184_s2, %s121_s26  ;;  %p125_p0 = scmp.lt.u32.totalorder %s121_s26, %s184_s2 }
  0xb6   :  { %p127_p1 = pnand %p125_p0, %p122_p13 }
  0xb8   :  { %130 = shalt.err (!%p127_p1)
}
  0xb9   :  { %69 = dma.vmem_to_hbm [thread:$0]  %s67_s1, 256, %s184_s2, [#allocation4]  }
  0xba   :  { %133 = dma.done.wait [#allocation4], 256  }
  0xbb   :  { %134 = vsyncadd [#allocation4], 4294967040 }
  0xbc   :  { %73 = vsyncpa [#allocation3], 1 }
  0xbd   :  { %74 = vsyncpa [#allocation4], 1 }

</bundles_post_ra>
